<compile_context>
chip_gen: v7x
topology: tpu7x:2x2x1
jax: 0.10.0
libtpu: 0.0.40
codegen_flags: <defaults>
</compile_context>

<pallas_src>
import jax
import jax.numpy as jnp
from jax.experimental import pallas as pl
from jax.experimental.pallas import tpu as pltpu


def _round_up(x: int, m: int) -> int:
    return ((x + m - 1) // m) * m


# ------------------------------- kernels ------------------------------------

def _ffn_kernel_resident(x_ref, w1_ref, b1_ref, w2_ref, b2_ref, o_ref):
    # Whole d_ff resident in VMEM: one fused pass per row tile.
    h = jnp.dot(x_ref[...], w1_ref[...], preferred_element_type=jnp.float32)
    h = jnp.maximum(h + b1_ref[...].astype(jnp.float32), 0.0)
    # TODO(synk): dropout omitted (inference / eval semantics -> identity).
    y = jnp.dot(h.astype(w2_ref.dtype), w2_ref[...],
                preferred_element_type=jnp.float32)
    o_ref[...] = (y + b2_ref[...].astype(jnp.float32)).astype(o_ref.dtype)


def _ffn_kernel_streamed(x_ref, w1_ref, b1_ref, w2_ref, b2_ref, o_ref, acc_ref):
    f = pl.program_id(1)

    h = jnp.dot(x_ref[...], w1_ref[...], preferred_element_type=jnp.float32)
    h = jnp.maximum(h + b1_ref[...].astype(jnp.float32), 0.0)
    # TODO(synk): dropout omitted (inference / eval semantics -> identity).
    partial = jnp.dot(h.astype(w2_ref.dtype), w2_ref[...],
                      preferred_element_type=jnp.float32)

    @pl.when(f == 0)
    def _():
        acc_ref[...] = partial           # first slab: plain write, no zero-fill

    @pl.when(f > 0)
    def _():
        acc_ref[...] += partial

    @pl.when(f == pl.num_programs(1) - 1)
    def _():
        o_ref[...] = (acc_ref[...]
                      + b2_ref[...].astype(jnp.float32)).astype(o_ref.dtype)


# ------------------------------- wrapper -------------------------------------

def _vmem_cap_bytes() -> int:
    """Usable per-TensorCore VMEM = physical capacity minus compiler headroom."""
    try:
        phys = int(pltpu.get_tpu_info().vmem_capacity_bytes)
    except Exception:
        phys = 64 << 20  # conservative fallback: v7x per-TC size
    # ~48 MiB on a 64 MiB TC (v7x); ~100 MiB on a 128 MiB TC (v5e/v6e).
    return max(min(int(phys * 0.8), phys - (16 << 20)), 24 << 20)


def positionwise_feed_forward(x, w1, b1, w2, b2, *, tile_m=512, tile_f=None):
    """Fused FFN:  relu(x @ W1 + b1) @ W2 + b2  (dropout in eval mode).

    x : [B, S, d_model]
    w1: [d_model, d_ff], b1: [d_ff]   (pre-transposed vs torch.nn.Linear)
    w2: [d_ff, d_model], b2: [d_model]
    tile_f=None -> auto (weights kept VMEM-resident whenever they fit).
    """
    B, S, d_model = x.shape
    d_ff = w1.shape[1]
    out_dtype = x.dtype
    M = B * S

    # Hoisted operand cast: stream x in the weight dtype (removes per-f-step
    # casts from the kernel; halves x HBM bytes for bf16 weights).
    x2 = x.reshape(M, d_model)
    if x2.dtype != w1.dtype:
        x2 = x2.astype(w1.dtype)

    x_bytes = x2.dtype.itemsize
    w_bytes = w1.dtype.itemsize
    o_bytes = jnp.dtype(out_dtype).itemsize
    sub = max(8, 32 // x_bytes)           # packed sublane rows: 8 f32 / 16 bf16

    cap = _vmem_cap_bytes()

    want_m = max(sub, min(_round_up(tile_m, sub), _round_up(M, sub)))

    def resident_need(tm):
        return (2 * tm * d_model * (x_bytes + o_bytes)                  # x/out tiles (dbl-buf)
                + 2 * (2 * d_model * d_ff + d_ff + d_model) * w_bytes   # W1, W2, biases
                + tm * d_ff * 4 + tm * d_model * 4)                     # f32 temporaries

    def streamed_need(tm, tf):
        return (2 * tm * d_model * (x_bytes + o_bytes)
                + 2 * (2 * d_model * tf + tf + d_model) * w_bytes       # slabs (dbl-buf)
                + tm * d_model * 4                                      # f32 acc scratch
                + tm * tf * 4)                                          # f32 h temp

    use_resident = ((tile_f is None or tile_f >= d_ff)
                    and resident_need(want_m) <= cap)

    tf = None
    if not use_resident:
        tf = _round_up(min(tile_f if tile_f is not None else 2048, d_ff), 128)
        while tf > 128 and streamed_need(want_m, tf) > cap:
            tf -= 128
        while streamed_need(want_m, tf) > cap and want_m > sub:
            want_m = max(sub, _round_up(want_m // 2, sub))

    # ---- Row tiling: prefer a divisor of M (no pad copy); pad as fallback. --
    tm = want_m
    Mp = M
    if M % sub == 0:
        best = None
        for t in range(want_m, sub - 1, -sub):
            if M % t == 0:
                best = t
                break
        if best is not None and best * 2 >= want_m:
            tm = best                      # exact divisor: no padded copy of x
        else:
            Mp = _round_up(M, want_m)
    else:
        Mp = _round_up(M, want_m)
    if Mp != M:
        # Fallback: zero-pad ragged rows (extra rows sliced off after the call).
        x2 = jnp.pad(x2, ((0, Mp - M), (0, 0)))

    num_row_tiles = Mp // tm
    b1_2d = b1.reshape(1, d_ff)
    b2_2d = b2.reshape(1, d_model)
    flops = 4 * M * d_model * d_ff         # two matmuls

    if use_resident:
        Fp = d_ff
        grid = (num_row_tiles,)
        in_specs = [
            pl.BlockSpec((tm, d_model), lambda i: (i, 0)),        # x rows
            pl.BlockSpec((d_model, d_ff), lambda i: (0, 0)),      # W1 (resident)
            pl.BlockSpec((1, d_ff), lambda i: (0, 0)),            # b1 (resident)
            pl.BlockSpec((d_ff, d_model), lambda i: (0, 0)),      # W2 (resident)
            pl.BlockSpec((1, d_model), lambda i: (0, 0)),         # b2 (resident)
        ]
        out_specs = pl.BlockSpec((tm, d_model), lambda i: (i, 0))
        scratch_shapes = []
        kernel = _ffn_kernel_resident
        dims = ("parallel",)
        weight_passes = 1                  # weights DMA'd exactly once
        need = resident_need(tm)
    else:
        Fp = _round_up(d_ff, tf)
        if Fp != d_ff:
            # Zero-padded W1 cols / b1 entries give relu(0)=0, which contributes
            # nothing through the (also zero-padded) W2 rows -> numerics unchanged.
            w1 = jnp.pad(w1, ((0, 0), (0, Fp - d_ff)))
            b1_2d = jnp.pad(b1_2d, ((0, 0), (0, Fp - d_ff)))
            w2 = jnp.pad(w2, ((0, Fp - d_ff), (0, 0)))
        grid = (num_row_tiles, Fp // tf)
        in_specs = [
            pl.BlockSpec((tm, d_model), lambda i, f: (i, 0)),     # x rows
            pl.BlockSpec((d_model, tf), lambda i, f: (0, f)),     # W1 slab
            pl.BlockSpec((1, tf), lambda i, f: (0, f)),           # b1 slab
            pl.BlockSpec((tf, d_model), lambda i, f: (f, 0)),     # W2 slab
            pl.BlockSpec((1, d_model), lambda i, f: (0, 0)),      # b2
        ]
        out_specs = pl.BlockSpec((tm, d_model), lambda i, f: (i, 0))
        scratch_shapes = [pltpu.VMEM((tm, d_model), jnp.float32)]
        kernel = _ffn_kernel_streamed
        dims = ("parallel", "arbitrary")
        weight_passes = num_row_tiles      # slabs re-streamed once per row tile
        need = streamed_need(tm, tf)

    vmem_limit = int(min(cap, max(int(need * 1.3), 32 << 20)))

    # Truthful advisory estimate: report the weight traffic of the real schedule.
    bytes_accessed = int(Mp * d_model * (x_bytes + o_bytes)
                         + weight_passes * (2 * d_model * Fp + Fp + d_model) * w_bytes)
    cost = pl.CostEstimate(flops=flops, transcendentals=0,
                           bytes_accessed=bytes_accessed)

    out2 = pl.pallas_call(
        kernel,
        out_shape=jax.ShapeDtypeStruct((Mp, d_model), out_dtype),
        grid_spec=pltpu.PrefetchScalarGridSpec(
            num_scalar_prefetch=0,
            grid=grid,
            in_specs=in_specs,
            out_specs=out_specs,
            scratch_shapes=scratch_shapes,
        ),
        compiler_params=pltpu.CompilerParams(
            dimension_semantics=dims,
            vmem_limit_bytes=vmem_limit),
        cost_estimate=cost,
    )(x2, w1, b1_2d, w2, b2_2d)

    if Mp != M:
        out2 = out2[:M]
    return out2.reshape(B, S, d_model)


# --------------------------------- tests -------------------------------------

if __name__ == "__main__":
    key = jax.random.PRNGKey(0)

    def make_params(k, d_model, d_ff, dtype=jnp.float32):
        kw1, kb1, kw2, kb2 = jax.random.split(k, 4)
        bound1 = 1.0 / (d_model ** 0.5)
        bound2 = 1.0 / (d_ff ** 0.5)
        w1 = jax.random.uniform(kw1, (d_model, d_ff), jnp.float32, -bound1, bound1)
        b1 = jax.random.uniform(kb1, (d_ff,), jnp.float32, -bound1, bound1)
        w2 = jax.random.uniform(kw2, (d_ff, d_model), jnp.float32, -bound2, bound2)
        b2 = jax.random.uniform(kb2, (d_model,), jnp.float32, -bound2, bound2)
        return (w1.astype(dtype), b1.astype(dtype),
                w2.astype(dtype), b2.astype(dtype))

    def ref_ffn(x, w1, b1, w2, b2):
        xf = x.astype(jnp.float32)
        h = jnp.maximum(xf @ w1.astype(jnp.float32) + b1.astype(jnp.float32), 0.0)
        return h @ w2.astype(jnp.float32) + b2.astype(jnp.float32)

    # --- Test 1: small module-consistent shapes (resident-weight path). ------
    B, S, d_model, d_ff = 2, 8, 32, 64
    kx, kp = jax.random.split(key)
    x = jax.random.normal(kx, (B, S, d_model), dtype=jnp.float32)
    w1, b1, w2, b2 = make_params(kp, d_model, d_ff)
    out = jax.block_until_ready(positionwise_feed_forward(x, w1, b1, w2, b2))
    assert out.shape == (B, S, d_model)
    assert jnp.allclose(out, ref_ffn(x, w1, b1, w2, b2), atol=1e-5, rtol=1e-5)

    # --- Test 2: ragged M handled without a pad copy (divisor row tile). -----
    k2 = jax.random.PRNGKey(1)
    kx2, kp2 = jax.random.split(k2)
    B2, S2, dm2, dff2 = 2, 200, 32, 256
    x2 = jax.random.normal(kx2, (B2, S2, dm2), dtype=jnp.float32)
    w1b, b1b, w2b, b2b = make_params(kp2, dm2, dff2)
    out2 = jax.block_until_ready(
        positionwise_feed_forward(x2, w1b, b1b, w2b, b2b))
    assert out2.shape == (B2, S2, dm2)
    assert jnp.allclose(out2, ref_ffn(x2, w1b, b1b, w2b, b2b),
                        atol=1e-4, rtol=1e-4)

    # --- Test 3: force the streamed d_ff-reduction path (accumulator). -------
    k3 = jax.random.PRNGKey(2)
    kx3, kp3 = jax.random.split(k3)
    B3, S3, dm3, dff3 = 3, 40, 128, 384
    x3 = jax.random.normal(kx3, (B3, S3, dm3), dtype=jnp.float32)
    w1c, b1c, w2c, b2c = make_params(kp3, dm3, dff3)
    out3 = jax.block_until_ready(
        positionwise_feed_forward(x3, w1c, b1c, w2c, b2c, tile_m=48, tile_f=128))
    assert out3.shape == (B3, S3, dm3)
    assert jnp.allclose(out3, ref_ffn(x3, w1c, b1c, w2c, b2c),
                        atol=1e-4, rtol=1e-4)

    # --- Test 4: bf16 weights streamed, f32 accumulation (resident path). ----
    k4 = jax.random.PRNGKey(3)
    kx4, kp4 = jax.random.split(k4)
    B4, S4, dm4, dff4 = 2, 64, 128, 512
    x4 = jax.random.normal(kx4, (B4, S4, dm4), dtype=jnp.float32)
    w1d, b1d, w2d, b2d = make_params(kp4, dm4, dff4, dtype=jnp.bfloat16)
    out4 = jax.block_until_ready(
        positionwise_feed_forward(x4, w1d, b1d, w2d, b2d))
    ref4 = ref_ffn(x4.astype(jnp.bfloat16), w1d, b1d, w2d, b2d)
    assert out4.shape == (B4, S4, dm4)
    assert jnp.allclose(out4, ref4, atol=5e-2, rtol=5e-2)

    print("KERNEL_OK")
</pallas_src>

<mosaic_0001>
module attributes {stable_mosaic.version = 11 : i64} {
  func.func @_ffn_kernel_resident(%arg0: i32, %arg1: memref<16x32xf32, #tpu.memory_space<vmem>>, %arg2: memref<32x64xf32, #tpu.memory_space<vmem>>, %arg3: memref<1x64xf32, #tpu.memory_space<vmem>>, %arg4: memref<64x32xf32, #tpu.memory_space<vmem>>, %arg5: memref<1x32xf32, #tpu.memory_space<vmem>>, %arg6: memref<16x32xf32, #tpu.memory_space<vmem>>) attributes {dimension_semantics = [#tpu.dimension_semantics<parallel>], iteration_bounds = array<i64: 1>, scalar_prefetch = 0 : i64, scratch_operands = 0 : i64, tpu.core_type = #tpu.core_type<tc>, window_params = [{transform_indices = @transform_0, window_bounds = array<i64: 16, 32>}, {pipeline_mode = #tpu.pipeline_mode<synchronous>, transform_indices = @transform_1, window_bounds = array<i64: 32, 64>}, {pipeline_mode = #tpu.pipeline_mode<synchronous>, transform_indices = @transform_2, window_bounds = array<i64: 1, 64>}, {pipeline_mode = #tpu.pipeline_mode<synchronous>, transform_indices = @transform_3, window_bounds = array<i64: 64, 32>}, {pipeline_mode = #tpu.pipeline_mode<synchronous>, transform_indices = @transform_4, window_bounds = array<i64: 1, 32>}, {transform_indices = @transform_5, window_bounds = array<i64: 16, 32>}]} {
    %c0 = arith.constant 0 : index
    %c0_0 = arith.constant 0 : index
    %0 = vector.load %arg1[%c0, %c0_0] : memref<16x32xf32, #tpu.memory_space<vmem>>, vector<16x32xf32>
    %c0_1 = arith.constant 0 : index
    %c0_2 = arith.constant 0 : index
    %1 = vector.load %arg2[%c0_1, %c0_2] : memref<32x64xf32, #tpu.memory_space<vmem>>, vector<32x64xf32>
    %cst = arith.constant dense<0.000000e+00> : vector<16x64xf32>
    %2 = tpu.matmul %0, %1, %cst {dimension_numbers = #tpu.dot_dimension_numbers<[1], [0], [0], [1], [0, 0, 1, 1], [], []>} : vector<16x32xf32>, vector<32x64xf32>, vector<16x64xf32> -> vector<16x64xf32>
    %c0_3 = arith.constant 0 : index
    %c0_4 = arith.constant 0 : index
    %3 = vector.load %arg3[%c0_3, %c0_4] : memref<1x64xf32, #tpu.memory_space<vmem>>, vector<1x64xf32>
    %4 = vector.broadcast %3 : vector<1x64xf32> to vector<16x64xf32>
    %5 = arith.addf %2, %4 : vector<16x64xf32>
    %cst_5 = arith.constant 0.000000e+00 : f32
    %6 = vector.broadcast %cst_5 : f32 to vector<16x64xf32>
    %7 = arith.maximumf %5, %6 : vector<16x64xf32>
    %c0_6 = arith.constant 0 : index
    %c0_7 = arith.constant 0 : index
    %8 = vector.load %arg4[%c0_6, %c0_7] : memref<64x32xf32, #tpu.memory_space<vmem>>, vector<64x32xf32>
    %cst_8 = arith.constant dense<0.000000e+00> : vector<16x32xf32>
    %9 = tpu.matmul %7, %8, %cst_8 {dimension_numbers = #tpu.dot_dimension_numbers<[1], [0], [0], [1], [0, 0, 1, 1], [], []>} : vector<16x64xf32>, vector<64x32xf32>, vector<16x32xf32> -> vector<16x32xf32>
    %c0_9 = arith.constant 0 : index
    %c0_10 = arith.constant 0 : index
    %10 = vector.load %arg5[%c0_9, %c0_10] : memref<1x32xf32, #tpu.memory_space<vmem>>, vector<1x32xf32>
    %11 = vector.broadcast %10 : vector<1x32xf32> to vector<16x32xf32>
    %12 = arith.addf %9, %11 : vector<16x32xf32>
    %c0_11 = arith.constant 0 : index
    %c0_12 = arith.constant 0 : index
    %13 = vector.load %arg6[%c0_11, %c0_12] : memref<16x32xf32, #tpu.memory_space<vmem>>, vector<16x32xf32>
    tpu.vector_store %arg6[%c0_11, %c0_12], %12 {strides = array<i32>} : memref<16x32xf32, #tpu.memory_space<vmem>>, vector<16x32xf32>,
    return
  }
  func.func @transform_0(%arg0: i32) -> (i32, i32) {
    %c0_i32 = arith.constant 0 : i32
    %c0_i32_0 = arith.constant 0 : i32
    return %arg0, %c0_i32 : i32, i32
  }
  func.func @transform_1(%arg0: i32) -> (i32, i32) {
    %c0_i32 = arith.constant 0 : i32
    %c0_i32_0 = arith.constant 0 : i32
    %c0_i32_1 = arith.constant 0 : i32
    return %c0_i32, %c0_i32_0 : i32, i32
  }
  func.func @transform_2(%arg0: i32) -> (i32, i32) {
    %c0_i32 = arith.constant 0 : i32
    %c0_i32_0 = arith.constant 0 : i32
    %c0_i32_1 = arith.constant 0 : i32
    return %c0_i32, %c0_i32_0 : i32, i32
  }
  func.func @transform_3(%arg0: i32) -> (i32, i32) {
    %c0_i32 = arith.constant 0 : i32
    %c0_i32_0 = arith.constant 0 : i32
    %c0_i32_1 = arith.constant 0 : i32
    return %c0_i32, %c0_i32_0 : i32, i32
  }
  func.func @transform_4(%arg0: i32) -> (i32, i32) {
    %c0_i32 = arith.constant 0 : i32
    %c0_i32_0 = arith.constant 0 : i32
    %c0_i32_1 = arith.constant 0 : i32
    return %c0_i32, %c0_i32_0 : i32, i32
  }
  func.func @transform_5(%arg0: i32) -> (i32, i32) {
    %c0_i32 = arith.constant 0 : i32
    %c0_i32_0 = arith.constant 0 : i32
    return %arg0, %c0_i32 : i32, i32
  }
}

</mosaic_0001>

<bundles_post_ra>
// kernel: tpu_custom_call.1
= control target key start
LH: loop header
LB: loop body
LE: loop exit
PB: predicated region body
PF: predicated region fallthrough
CT: control target
= control target key end

     0   :  { %vm34_vm0 = vcmask 261120   ;;  %s433_s0 = inlined_call_operand.vmem [shape: f32[16,32], index: 0, kind: input, shape index: {}]   ;;  %s434_s1 = inlined_call_operand.vmem [shape: f32[32,64], index: 1, kind: input, shape index: {}]   ;;  %s435_s2 = inlined_call_operand.vmem [shape: f32[1,64], index: 2, kind: input, shape index: {}]   ;;  %s436_s3 = inlined_call_operand.vmem [shape: f32[64,32], index: 3, kind: input, shape index: {}]   ;;  %s437_s4 = inlined_call_operand.vmem [shape: f32[1,32], index: 4, kind: input, shape index: {}]   ;;  %s438_s5 = inlined_call_operand.hbm [shape: f32[16,32], index: 5, kind: output, shape index: {}]  }
   0x1   :  { %v23_v0 = vld [vmem:[%s434_s1] sm:$0xff]  ;;  %v24_v1 = vld [vmem:[%s434_s1 + $0x8] sm:$0xff]  ;;  %v25_v2 = vld [vmem:[%s434_s1 + $0x10] sm:$0xff] }
   0x2   :  { %v285_v3 = vpack.c.bf16 %v24_v1, %v23_v0  ;;  %v26_v4 = vld [vmem:[%s434_s1 + $0x18] sm:$0xff]  ;;  %v21_v5 = vld [vmem:[%s433_s0] sm:$0xff]  ;;  %v119_v8 = vld [vmem:[%s436_s3 + $0x8] sm:$0xff] }
   0x3   :  { %v289_v6 = vpack.c.bf16 %v26_v4, %v25_v2  ;;  %263 = vmatprep.mubr.msk.f32.mxu0 %vm34_vm0, %v21_v5  ;;  %v118_v7 = vld [vmem:[%s436_s3] sm:$0xff]  ;;  %v120_v9 = vld [vmem:[%s436_s3 + $0x10] sm:$0xff]  ;;  %v121_v11 = vld [vmem:[%s436_s3 + $0x18] sm:$0xff] }
   0x4   :  { %286 = vmatprep.subr.bf16.mxu0 %v285_v3  ;;  %v293_v10 = vpack.c.bf16 %v119_v8, %v118_v7  ;;  %v297_v12 = vpack.c.bf16 %v121_v11, %v120_v9  ;;  %v122_v13 = vld [vmem:[%s436_s3 + $0x20] sm:$0xff]  ;;  %v123_v14 = vld [vmem:[%s436_s3 + $0x28] sm:$0xff] }
   0x5   :  { %288 = vmatpush3.bf16.msra.mxu0 %v285_v3 }
   0x6   :  { %10 = vsyncpa [#allocation3], 0  ;;  %290 = vmatprep.subr.bf16.mxu0 %v289_v6  ;;  %294 = vmatprep.subr.bf16.mxu1 %v293_v10  ;;  %v301_v15 = vpack.c.bf16 %v123_v14, %v122_v13  ;;  %v22_v16 = vld [vmem:[%s433_s0 + $0x8] sm:$0xff]  ;;  %v124_v17 = vld [vmem:[%s436_s3 + $0x30] sm:$0xff]  ;;  %vm133_vm1 = vcmask 523264  }
   0x7   :  { %296 = vmatpush3.bf16.msra.mxu1 %v293_v10  ;;  %v125_v18 = vld [vmem:[%s436_s3 + $0x38] sm:$0xff]  ;;  %v233_v20 = vld [vmem:[%s435_s2] ss:$0 sm:$0xff]  ;;  %s336_s3 = smov [#allocation2]  }
   0x8   :  { %298 = vmatprep.subr.bf16.mxu1 %v297_v12  ;;  %v305_v19 = vpack.c.bf16 %v125_v18, %v124_v17  ;;  %v236_v27 = vld [vmem:[%s437_s4] ss:$0 sm:$0xff]  ;;  %s222_s23 = sshll.u32 %s336_s3, 4  ;;  %s223_s23 = int_to_ptr.vmem [resolvable:$true] %s222_s23 }
   0x9   :  { %292 = vmatpush3.bf16.msra.mxu0 %v289_v6  ;;  %s312_s2 = scalar_lea.vmem %s223_s23, 256  ;;  %p317_p1 = scmp.lt.s32.totalorder %s223_s23, %s223_s23 }
   0xa   :  { %p313_p0 = scmp.ne.s32.totalorder %s223_s23, %s312_s2  ;;  %p318_p2 = scmp.lt.s32.totalorder %s312_s2, %s312_s2 }
   0xb   :  { %300 = vmatpush3.bf16.msra.mxu1 %v297_v12 }
   0xc   :  { %264 = vmatmul.mubr.msk.f32.vlgmr.msra.gmra.mrb[0].mxu0 %vm34_vm0, %v22_v16  ;;  %302 = vmatprep.subr.bf16.mxu1 %v301_v15  ;;  %p319_p3 = por %p318_p2, %p317_p1 }
   0xe   :  { %p320_p4 = pnand %p319_p3, %p313_p0 }
   0xf   :  { %304 = vmatpush3.bf16.msra.mxu1 %v301_v15 }
  0x10   :  { %306 = vmatprep.subr.bf16.mxu1 %v305_v19 }
  0x13   :  { %308 = vmatpush3.bf16.msra.mxu1 %v305_v19 }
  0xdf   :  { %v265_v21 = vpop.f32.mrb[0].mxu0 }
  0xe0   :  { %v113_v22 = vadd.f32 %v265_v21, %v233_v20  ;;  %v107_v23 = vpop.f32.mrb[1].mxu0 }
  0xe1   :  { %v108_v24 = vadd.f32 %v233_v20, %v107_v23 }
  0xe2   :  { %v117_v26 = vmax.f32 %v113_v22, 0.0 }
  0xe3   :  { %v116_v25 = vmax.f32 %v108_v24, 0.0 }
  0xe5   :  { %282 = vmatprep.mubr.msk.f32.mxu1 %vm133_vm1, %v116_v25 }
  0xe6   :  { %283 = vmatmul.mubr.msk.f32.vlgmr.msra.gmra.mrb[0].mxu1 %vm133_vm1, %v117_v26 }
 0x1b9   :  { %v284_v28 = vpop.f32.mrb[0].mxu1 }
 0x1ba   :  { %v212_v29 = vadd.f32 %v284_v28, %v236_v27  ;;  %v206_v30 = vpop.f32.mrb[1].mxu1 }
 0x1bb   :  { %v207_v31 = vadd.f32 %v236_v27, %v206_v30 }
 0x1bc   :  { %216 = vst.msk [vmem:[#allocation2 + $0x8] sm:$0xff] %vm34_vm0, %v212_v29 }
 0x1bd   :  { %215 = vst.msk [vmem:[#allocation2] sm:$0xff] %vm34_vm0, %v207_v31 }
 0x1be   :  { %323 = shalt.err (!%p320_p4)
}
 0x1bf   :  { %s324_s25 = scalar_lea.hbm %s438_s5, 256 }
 0x1c0   :  { %p325_p5 = scmp.ne.s32.totalorder %s438_s5, %s324_s25  ;;  %p328_p6 = scmp.lt.u32.totalorder %s324_s25, %s438_s5 }
 0x1c2   :  { %p330_p7 = pnand %p328_p6, %p325_p5 }
 0x1c4   :  { %333 = shalt.err (!%p330_p7)
}
 0x1c5   :  { %s337_s30 = smov 128   ;;  %s338_s6 = smov 8  }
 0x1c6   :  { %228 = dma.vmem_to_hbm [thread:$0]  %s223_s23, 256, %s438_s5, [#allocation3], %s337_s30, %s337_s30, %s338_s6  }
 0x1c7   :  { %334 = dma.done.wait [#allocation3], 256  }
 0x1c8   :  { %335 = vsyncadd [#allocation3], 4294967040 }
 0x1c9   :  { %232 = vsyncpa [#allocation3], 1 }

</bundles_post_ra>
